<compile_context>
chip_gen: v5e
topology: v5e:2x2
jax: 0.10.0
libtpu: 0.0.40
codegen_flags: <defaults>
</compile_context>

<pallas_src>
import math

import jax
import jax.numpy as jnp
from jax.experimental import pallas as pl
from jax.experimental.pallas import tpu as pltpu


def _round_up(x, m):
    return ((x + m - 1) // m) * m


def _cdiv(a, b):
    return (a + b - 1) // b


def _sublane(dtype):
    # Minimum sublane multiple by element width: f32 -> 8, bf16 -> 16, i8/fp8 -> 32.
    return {4: 8, 2: 16, 1: 32}.get(jnp.dtype(dtype).itemsize, 8)


def _vmem_capacity_bytes():
    try:
        cap = getattr(pltpu.get_tpu_info(), "vmem_capacity_bytes", None)
        if cap:
            return int(cap)
    except Exception:
        pass
    return 64 << 20  # conservative default (v7x per-TensorCore VMEM)


def prepare_mlp_embedder_params(w1, b1, w2, b2, *, compute_dtype=jnp.bfloat16):
    """One-time (init-time) padding + cast of the MLPEmbedder parameters.

    w1: [in_dim, hidden], w2: [hidden, hidden] (pre-transposed from PyTorch's
    [out, in] layout), b1/b2: [hidden].  Feature dims are zero-padded to
    multiples of 128 (skipped when already aligned) and weights are cast to the
    MXU compute dtype; biases stay f32 (added on the f32 accumulator).
    """
    in_dim, hidden = w1.shape
    in_pad = _round_up(in_dim, 128)
    hid_pad = _round_up(hidden, 128)

    def pad2(a, rows, cols):
        if a.shape == (rows, cols):
            return a
        return jnp.pad(a, ((0, rows - a.shape[0]), (0, cols - a.shape[1])))

    return dict(
        w1=pad2(w1, in_pad, hid_pad).astype(compute_dtype),
        w2=pad2(w2, hid_pad, hid_pad).astype(compute_dtype),
        b1=pad2(b1.astype(jnp.float32).reshape(1, hidden), 1, hid_pad),
        b2=pad2(b2.astype(jnp.float32).reshape(1, hidden), 1, hid_pad),
        in_dim=in_dim,
        hidden=hidden,
        compute_dtype=jnp.dtype(compute_dtype),
    )


def _make_kernel(compute_dtype):
    def kernel(x_ref, w1_ref, b1_ref, w2_ref, b2_ref, o_ref, h_ref):
        # First matmul + bias + SiLU: once per row tile (column step j == 0);
        # the activation is kept in VMEM scratch and reused for every W2
        # column tile of this row tile.
        @pl.when(pl.program_id(1) == 0)
        def _():
            h = jnp.dot(x_ref[...].astype(compute_dtype), w1_ref[...],
                        preferred_element_type=jnp.float32)
            h = h + b1_ref[...]                 # bias add on the f32 accumulator
            h = h * jax.nn.sigmoid(h)           # SiLU (sigmoid -> EUP slot)
            h_ref[...] = h.astype(compute_dtype)

        # Second matmul: one W2 column tile per grid step, f32 accumulation.
        y = jnp.dot(h_ref[...], w2_ref[...], preferred_element_type=jnp.float32)
        y = y + b2_ref[...]
        o_ref[...] = y.astype(o_ref.dtype)

    return kernel


def mlp_embedder(x, params, *, tm_max=None, tn_max=512):
    """x: [..., in_dim] -> [..., hidden]  (same broadcasting as nn.Linear)."""
    in_dim = params["in_dim"]
    hidden = params["hidden"]
    compute_dtype = params["compute_dtype"]
    w1p, b1p, w2p, b2p = params["w1"], params["b1"], params["w2"], params["b2"]
    in_pad, hid_pad = w1p.shape
    out_dtype = x.dtype

    lead = x.shape[:-1]
    rows = int(math.prod(lead)) if lead else 1
    x2d = x.reshape(rows, in_dim)
    if in_pad != in_dim:                 # feature pad only; rows are never padded
        x2d = jnp.pad(x2d, ((0, 0), (0, in_pad - in_dim)))

    cap = _vmem_capacity_bytes()
    if tm_max is None:
        # v5e/v6e (128 MiB VMEM) can afford longer M runs; v7x (64 MiB) cannot.
        tm_max = 512 if cap >= (100 << 20) else 256

    # --- tile selection -----------------------------------------------------
    sub = max(_sublane(x.dtype), _sublane(compute_dtype))   # sublane multiple
    rows_sub = _round_up(rows, sub)
    tm = min(_round_up(tm_max, sub), rows_sub)
    if rows_sub >= 2 * sub:
        # guarantee >= 2 row tiles so ("parallel",) sharding has work on v7x.
        tm = min(tm, _round_up(_cdiv(rows_sub, 2), sub))
    n_row_tiles = _cdiv(rows, tm)

    tn = min(_round_up(tn_max, 128), hid_pad)
    while hid_pad % tn:                  # tn must evenly tile the padded hidden dim
        tn -= 128
    n_col_tiles = hid_pad // tn

    cbytes = jnp.dtype(compute_dtype).itemsize
    xbytes = jnp.dtype(x.dtype).itemsize
    obytes = jnp.dtype(out_dtype).itemsize

    cost = pl.CostEstimate(
        flops=2 * rows * hid_pad * (in_pad + hid_pad),
        transcendentals=rows * hid_pad,
        bytes_accessed=int(x2d.size * xbytes + w1p.size * cbytes
                           + w2p.size * cbytes + b1p.size * 4 + b2p.size * 4
                           + rows * hid_pad * obytes),
    )

    def build(single_buffer_invariant):
        def spec(shape, imap, invariant=False):
            if invariant and single_buffer_invariant:
                return pl.BlockSpec(shape, imap, pipeline_mode=pl.Buffered(1))
            return pl.BlockSpec(shape, imap)

        def bufs(invariant):
            return 1 if (invariant and single_buffer_invariant) else 2

        # VMEM footprint: tiles x buffer count + scratch + f32 temporaries.
        vmem_need = (
            bufs(n_row_tiles == 1) * tm * in_pad * xbytes          # x tile
            + bufs(True) * in_pad * hid_pad * cbytes               # W1 (resident)
            + bufs(True) * hid_pad * 4                             # b1 (resident)
            + bufs(n_col_tiles == 1) * hid_pad * tn * cbytes       # W2 column tile
            + bufs(n_col_tiles == 1) * tn * 4                      # b2 column tile
            + 2 * tm * tn * obytes                                 # out tile
            + tm * hid_pad * cbytes                                # h scratch
            + tm * hid_pad * 4 + tm * tn * 4                       # f32 temps
        )
        vmem_limit = min(max(int(vmem_need * 1.25) + (2 << 20), 16 << 20),
                         cap - (2 << 20))

        return pl.pallas_call(
            _make_kernel(compute_dtype),
            out_shape=jax.ShapeDtypeStruct((rows, hid_pad), out_dtype),
            grid_spec=pltpu.PrefetchScalarGridSpec(
                num_scalar_prefetch=0,
                grid=(n_row_tiles, n_col_tiles),
                in_specs=[
                    spec((tm, in_pad), lambda i, j: (i, 0),
                         invariant=(n_row_tiles == 1)),            # x row tile
                    spec((in_pad, hid_pad), lambda i, j: (0, 0),
                         invariant=True),                          # W1 resident
                    spec((1, hid_pad), lambda i, j: (0, 0),
                         invariant=True),                          # b1 resident
                    spec((hid_pad, tn), lambda i, j: (0, j),
                         invariant=(n_col_tiles == 1)),            # W2 column tile
                    spec((1, tn), lambda i, j: (0, j),
                         invariant=(n_col_tiles == 1)),            # b2 column tile
                ],
                out_specs=pl.BlockSpec((tm, tn), lambda i, j: (i, j)),
                scratch_shapes=[pltpu.VMEM((tm, hid_pad), compute_dtype)],
            ),
            compiler_params=pltpu.CompilerParams(
                dimension_semantics=("parallel", "arbitrary"),
                vmem_limit_bytes=int(vmem_limit),
            ),
            cost_estimate=cost,
        )

    try:
        out = build(True)(x2d, w1p, b1p, w2p, b2p)
    except Exception:
        # Best-effort fallback if Buffered(1) pipelining is not supported by
        # this JAX/Mosaic build: same kernel with default double-buffering.
        out = build(False)(x2d, w1p, b1p, w2p, b2p)

    if hid_pad != hidden:
        out = out[:, :hidden]
    return out.reshape(*lead, hidden)


def _reference(x, w1, b1, w2, b2, compute_dtype=jnp.bfloat16):
    """Pure-JAX reference mirroring the kernel's compute-dtype path."""
    f32 = jnp.float32
    xc = x.astype(compute_dtype).astype(f32)
    w1c = w1.astype(compute_dtype).astype(f32)
    w2c = w2.astype(compute_dtype).astype(f32)
    h = xc @ w1c + b1.astype(f32)
    h = h * jax.nn.sigmoid(h)
    hc = h.astype(compute_dtype).astype(f32)
    y = hc @ w2c + b2.astype(f32)
    return y.astype(x.dtype)


if __name__ == "__main__":
    in_dim, hidden_dim = 32, 64
    batch, seq = 2, 8

    key = jax.random.PRNGKey(0)
    k_x, k_w1, k_b1, k_w2, k_b2 = jax.random.split(key, 5)

    # Weights stored [in, out] so the kernel computes y = x @ W + b.
    x = jax.random.normal(k_x, (batch, seq, in_dim), dtype=jnp.float32)
    w1 = jax.random.normal(k_w1, (in_dim, hidden_dim), dtype=jnp.float32) * 0.1
    b1 = jax.random.normal(k_b1, (hidden_dim,), dtype=jnp.float32) * 0.1
    w2 = jax.random.normal(k_w2, (hidden_dim, hidden_dim), dtype=jnp.float32) * 0.1
    b2 = jax.random.normal(k_b2, (hidden_dim,), dtype=jnp.float32) * 0.1

    params = prepare_mlp_embedder_params(w1, b1, w2, b2)   # bf16 compute path
    out = jax.block_until_ready(mlp_embedder(x, params))

    ref = _reference(x, w1, b1, w2, b2)
    assert out.shape == (batch, seq, hidden_dim), out.shape
    max_err = float(jnp.max(jnp.abs(out - ref)))
    assert jnp.allclose(out, ref, atol=5e-3, rtol=5e-3), max_err
    print("KERNEL_OK")
</pallas_src>

<mosaic_0001>
module attributes {stable_mosaic.version = 11 : i64} {
  func.func @kernel(%arg0: i32, %arg1: i32, %arg2: memref<16x128xf32, #tpu.memory_space<vmem>>, %arg3: memref<128x128xbf16, #tpu.memory_space<vmem>>, %arg4: memref<1x128xf32, #tpu.memory_space<vmem>>, %arg5: memref<128x128xbf16, #tpu.memory_space<vmem>>, %arg6: memref<1x128xf32, #tpu.memory_space<vmem>>, %arg7: memref<16x128xf32, #tpu.memory_space<vmem>>, %arg8: memref<16x128xbf16, #tpu.memory_space<vmem>>) attributes {dimension_semantics = [#tpu.dimension_semantics<parallel>, #tpu.dimension_semantics<arbitrary>], iteration_bounds = array<i64: 1, 1>, scalar_prefetch = 0 : i64, scratch_operands = 1 : i64, tpu.core_type = #tpu.core_type<tc>, window_params = [{pipeline_mode = #tpu.pipeline_mode<synchronous>, transform_indices = @transform_0, window_bounds = array<i64: 16, 128>}, {pipeline_mode = #tpu.pipeline_mode<synchronous>, transform_indices = @transform_1, window_bounds = array<i64: 128, 128>}, {pipeline_mode = #tpu.pipeline_mode<synchronous>, transform_indices = @transform_2, window_bounds = array<i64: 1, 128>}, {pipeline_mode = #tpu.pipeline_mode<synchronous>, transform_indices = @transform_3, window_bounds = array<i64: 128, 128>}, {pipeline_mode = #tpu.pipeline_mode<synchronous>, transform_indices = @transform_4, window_bounds = array<i64: 1, 128>}, {transform_indices = @transform_5, window_bounds = array<i64: 16, 128>}]} {
    %c0_i32 = arith.constant 0 : i32
    %0 = arith.cmpi eq, %arg1, %c0_i32 : i32
    %1 = arith.extui %0 : i1 to i32
    %c0_i32_0 = arith.constant 0 : i32
    %2 = arith.cmpi ne, %1, %c0_i32_0 : i32
    scf.if %2 {
      %c0_8 = arith.constant 0 : index
      %c0_9 = arith.constant 0 : index
      %10 = vector.load %arg2[%c0_8, %c0_9] : memref<16x128xf32, #tpu.memory_space<vmem>>, vector<16x128xf32>
      %11 = arith.truncf %10 : vector<16x128xf32> to vector<16x128xbf16>
      %c0_10 = arith.constant 0 : index
      %c0_11 = arith.constant 0 : index
      %12 = vector.load %arg3[%c0_10, %c0_11] : memref<128x128xbf16, #tpu.memory_space<vmem>>, vector<128x128xbf16>
      %cst_12 = arith.constant dense<0.000000e+00> : vector<16x128xf32>
      %13 = tpu.matmul %11, %12, %cst_12 {dimension_numbers = #tpu.dot_dimension_numbers<[1], [0], [0], [1], [0, 0, 1, 1], [], []>} : vector<16x128xbf16>, vector<128x128xbf16>, vector<16x128xf32> -> vector<16x128xf32>
      %c0_13 = arith.constant 0 : index
      %c0_14 = arith.constant 0 : index
      %14 = vector.load %arg4[%c0_13, %c0_14] : memref<1x128xf32, #tpu.memory_space<vmem>>, vector<1x128xf32>
      %15 = vector.broadcast %14 : vector<1x128xf32> to vector<16x128xf32>
      %16 = arith.addf %13, %15 : vector<16x128xf32>
      %17 = arith.negf %16 : vector<16x128xf32>
      %18 = math.exp %17 : vector<16x128xf32>
      %cst_15 = arith.constant 1.000000e+00 : f32
      %19 = vector.broadcast %cst_15 : f32 to vector<16x128xf32>
      %20 = arith.addf %19, %18 : vector<16x128xf32>
      %21 = arith.divf %19, %20 : vector<16x128xf32>
      %22 = arith.mulf %16, %21 : vector<16x128xf32>
      %23 = arith.truncf %22 : vector<16x128xf32> to vector<16x128xbf16>
      %c0_16 = arith.constant 0 : index
      %c0_17 = arith.constant 0 : index
      %24 = vector.load %arg8[%c0_16, %c0_17] : memref<16x128xbf16, #tpu.memory_space<vmem>>, vector<16x128xbf16>
      tpu.vector_store %arg8[%c0_16, %c0_17], %23 {strides = array<i32>} : memref<16x128xbf16, #tpu.memory_space<vmem>>, vector<16x128xbf16>,
    } else {
    }
    %c0 = arith.constant 0 : index
    %c0_1 = arith.constant 0 : index
    %3 = vector.load %arg8[%c0, %c0_1] : memref<16x128xbf16, #tpu.memory_space<vmem>>, vector<16x128xbf16>
    %c0_2 = arith.constant 0 : index
    %c0_3 = arith.constant 0 : index
    %4 = vector.load %arg5[%c0_2, %c0_3] : memref<128x128xbf16, #tpu.memory_space<vmem>>, vector<128x128xbf16>
    %cst = arith.constant dense<0.000000e+00> : vector<16x128xf32>
    %5 = tpu.matmul %3, %4, %cst {dimension_numbers = #tpu.dot_dimension_numbers<[1], [0], [0], [1], [0, 0, 1, 1], [], []>} : vector<16x128xbf16>, vector<128x128xbf16>, vector<16x128xf32> -> vector<16x128xf32>
    %c0_4 = arith.constant 0 : index
    %c0_5 = arith.constant 0 : index
    %6 = vector.load %arg6[%c0_4, %c0_5] : memref<1x128xf32, #tpu.memory_space<vmem>>, vector<1x128xf32>
    %7 = vector.broadcast %6 : vector<1x128xf32> to vector<16x128xf32>
    %8 = arith.addf %5, %7 : vector<16x128xf32>
    %c0_6 = arith.constant 0 : index
    %c0_7 = arith.constant 0 : index
    %9 = vector.load %arg7[%c0_6, %c0_7] : memref<16x128xf32, #tpu.memory_space<vmem>>, vector<16x128xf32>
    tpu.vector_store %arg7[%c0_6, %c0_7], %8 {strides = array<i32>} : memref<16x128xf32, #tpu.memory_space<vmem>>, vector<16x128xf32>,
    return
  }
  func.func @transform_0(%arg0: i32, %arg1: i32) -> (i32, i32) {
    %c0_i32 = arith.constant 0 : i32
    %c0_i32_0 = arith.constant 0 : i32
    return %arg0, %c0_i32 : i32, i32
  }
  func.func @transform_1(%arg0: i32, %arg1: i32) -> (i32, i32) {
    %c0_i32 = arith.constant 0 : i32
    %c0_i32_0 = arith.constant 0 : i32
    %c0_i32_1 = arith.constant 0 : i32
    return %c0_i32, %c0_i32_0 : i32, i32
  }
  func.func @transform_2(%arg0: i32, %arg1: i32) -> (i32, i32) {
    %c0_i32 = arith.constant 0 : i32
    %c0_i32_0 = arith.constant 0 : i32
    %c0_i32_1 = arith.constant 0 : i32
    return %c0_i32, %c0_i32_0 : i32, i32
  }
  func.func @transform_3(%arg0: i32, %arg1: i32) -> (i32, i32) {
    %c0_i32 = arith.constant 0 : i32
    %c0_i32_0 = arith.constant 0 : i32
    return %c0_i32, %arg1 : i32, i32
  }
  func.func @transform_4(%arg0: i32, %arg1: i32) -> (i32, i32) {
    %c0_i32 = arith.constant 0 : i32
    %c0_i32_0 = arith.constant 0 : i32
    return %c0_i32, %arg1 : i32, i32
  }
  func.func @transform_5(%arg0: i32, %arg1: i32) -> (i32, i32) {
    %c0_i32 = arith.constant 0 : i32
    return %arg0, %arg1 : i32, i32
  }
}

module attributes {stable_mosaic.version = 11 : i64} {
  func.func @kernel(%arg0: i32, %arg1: i32, %arg2: memref<16x128xf32, #tpu.memory_space<vmem>>, %arg3: memref<128x128xbf16, #tpu.memory_space<vmem>>, %arg4: memref<1x128xf32, #tpu.memory_space<vmem>>, %arg5: memref<128x128xbf16, #tpu.memory_space<vmem>>, %arg6: memref<1x128xf32, #tpu.memory_space<vmem>>, %arg7: memref<16x128xf32, #tpu.memory_space<vmem>>, %arg8: memref<16x128xbf16, #tpu.memory_space<vmem>>) attributes {dimension_semantics = [#tpu.dimension_semantics<parallel>, #tpu.dimension_semantics<arbitrary>], iteration_bounds = array<i64: 1, 1>, scalar_prefetch = 0 : i64, scratch_operands = 1 : i64, tpu.core_type = #tpu.core_type<tc>, window_params = [{transform_indices = @transform_0, window_bounds = array<i64: 16, 128>}, {pipeline_mode = #tpu.pipeline_mode<synchronous>, transform_indices = @transform_1, window_bounds = array<i64: 128, 128>}, {pipeline_mode = #tpu.pipeline_mode<synchronous>, transform_indices = @transform_2, window_bounds = array<i64: 1, 128>}, {transform_indices = @transform_3, window_bounds = array<i64: 128, 128>}, {transform_indices = @transform_4, window_bounds = array<i64: 1, 128>}, {transform_indices = @transform_5, window_bounds = array<i64: 16, 128>}]} {
    %c0_i32 = arith.constant 0 : i32
    %0 = arith.cmpi eq, %arg1, %c0_i32 : i32
    %1 = arith.extui %0 : i1 to i32
    %c0_i32_0 = arith.constant 0 : i32
    %2 = arith.cmpi ne, %1, %c0_i32_0 : i32
    scf.if %2 {
      %c0_8 = arith.constant 0 : index
      %c0_9 = arith.constant 0 : index
      %10 = vector.load %arg2[%c0_8, %c0_9] : memref<16x128xf32, #tpu.memory_space<vmem>>, vector<16x128xf32>
      %11 = arith.truncf %10 : vector<16x128xf32> to vector<16x128xbf16>
      %c0_10 = arith.constant 0 : index
      %c0_11 = arith.constant 0 : index
      %12 = vector.load %arg3[%c0_10, %c0_11] : memref<128x128xbf16, #tpu.memory_space<vmem>>, vector<128x128xbf16>
      %cst_12 = arith.constant dense<0.000000e+00> : vector<16x128xf32>
      %13 = tpu.matmul %11, %12, %cst_12 {dimension_numbers = #tpu.dot_dimension_numbers<[1], [0], [0], [1], [0, 0, 1, 1], [], []>} : vector<16x128xbf16>, vector<128x128xbf16>, vector<16x128xf32> -> vector<16x128xf32>
      %c0_13 = arith.constant 0 : index
      %c0_14 = arith.constant 0 : index
      %14 = vector.load %arg4[%c0_13, %c0_14] : memref<1x128xf32, #tpu.memory_space<vmem>>, vector<1x128xf32>
      %15 = vector.broadcast %14 : vector<1x128xf32> to vector<16x128xf32>
      %16 = arith.addf %13, %15 : vector<16x128xf32>
      %17 = arith.negf %16 : vector<16x128xf32>
      %18 = math.exp %17 : vector<16x128xf32>
      %cst_15 = arith.constant 1.000000e+00 : f32
      %19 = vector.broadcast %cst_15 : f32 to vector<16x128xf32>
      %20 = arith.addf %19, %18 : vector<16x128xf32>
      %21 = arith.divf %19, %20 : vector<16x128xf32>
      %22 = arith.mulf %16, %21 : vector<16x128xf32>
      %23 = arith.truncf %22 : vector<16x128xf32> to vector<16x128xbf16>
      %c0_16 = arith.constant 0 : index
      %c0_17 = arith.constant 0 : index
      %24 = vector.load %arg8[%c0_16, %c0_17] : memref<16x128xbf16, #tpu.memory_space<vmem>>, vector<16x128xbf16>
      tpu.vector_store %arg8[%c0_16, %c0_17], %23 {strides = array<i32>} : memref<16x128xbf16, #tpu.memory_space<vmem>>, vector<16x128xbf16>,
    } else {
    }
    %c0 = arith.constant 0 : index
    %c0_1 = arith.constant 0 : index
    %3 = vector.load %arg8[%c0, %c0_1] : memref<16x128xbf16, #tpu.memory_space<vmem>>, vector<16x128xbf16>
    %c0_2 = arith.constant 0 : index
    %c0_3 = arith.constant 0 : index
    %4 = vector.load %arg5[%c0_2, %c0_3] : memref<128x128xbf16, #tpu.memory_space<vmem>>, vector<128x128xbf16>
    %cst = arith.constant dense<0.000000e+00> : vector<16x128xf32>
    %5 = tpu.matmul %3, %4, %cst {dimension_numbers = #tpu.dot_dimension_numbers<[1], [0], [0], [1], [0, 0, 1, 1], [], []>} : vector<16x128xbf16>, vector<128x128xbf16>, vector<16x128xf32> -> vector<16x128xf32>
    %c0_4 = arith.constant 0 : index
    %c0_5 = arith.constant 0 : index
    %6 = vector.load %arg6[%c0_4, %c0_5] : memref<1x128xf32, #tpu.memory_space<vmem>>, vector<1x128xf32>
    %7 = vector.broadcast %6 : vector<1x128xf32> to vector<16x128xf32>
    %8 = arith.addf %5, %7 : vector<16x128xf32>
    %c0_6 = arith.constant 0 : index
    %c0_7 = arith.constant 0 : index
    %9 = vector.load %arg7[%c0_6, %c0_7] : memref<16x128xf32, #tpu.memory_space<vmem>>, vector<16x128xf32>
    tpu.vector_store %arg7[%c0_6, %c0_7], %8 {strides = array<i32>} : memref<16x128xf32, #tpu.memory_space<vmem>>, vector<16x128xf32>,
    return
  }
  func.func @transform_0(%arg0: i32, %arg1: i32) -> (i32, i32) {
    %c0_i32 = arith.constant 0 : i32
    %c0_i32_0 = arith.constant 0 : i32
    return %arg0, %c0_i32 : i32, i32
  }
  func.func @transform_1(%arg0: i32, %arg1: i32) -> (i32, i32) {
    %c0_i32 = arith.constant 0 : i32
    %c0_i32_0 = arith.constant 0 : i32
    %c0_i32_1 = arith.constant 0 : i32
    return %c0_i32, %c0_i32_0 : i32, i32
  }
  func.func @transform_2(%arg0: i32, %arg1: i32) -> (i32, i32) {
    %c0_i32 = arith.constant 0 : i32
    %c0_i32_0 = arith.constant 0 : i32
    %c0_i32_1 = arith.constant 0 : i32
    return %c0_i32, %c0_i32_0 : i32, i32
  }
  func.func @transform_3(%arg0: i32, %arg1: i32) -> (i32, i32) {
    %c0_i32 = arith.constant 0 : i32
    %c0_i32_0 = arith.constant 0 : i32
    return %c0_i32, %arg1 : i32, i32
  }
  func.func @transform_4(%arg0: i32, %arg1: i32) -> (i32, i32) {
    %c0_i32 = arith.constant 0 : i32
    %c0_i32_0 = arith.constant 0 : i32
    return %c0_i32, %arg1 : i32, i32
  }
  func.func @transform_5(%arg0: i32, %arg1: i32) -> (i32, i32) {
    %c0_i32 = arith.constant 0 : i32
    return %arg0, %arg1 : i32, i32
  }
}

</mosaic_0001>

<bundles_post_ra>
// kernel: tpu_custom_call.1
= control target key start
LH: loop header
LB: loop body
LE: loop exit
PB: predicated region body
PF: predicated region fallthrough
CT: control target
= control target key end

     0   :  { %10 = vsyncpa [#allocation4], 0  ;;  %s587_s0 = inlined_call_operand.hbm [shape: f32[16,128], index: 0, kind: input, shape index: {}]   ;;  %s588_s1 = inlined_call_operand.hbm [shape: bf16[128,128], index: 1, kind: input, shape index: {}]   ;;  %s589_s2 = inlined_call_operand.vmem [shape: f32[1,128], index: 2, kind: input, shape index: {}]   ;;  %s590_s3 = inlined_call_operand.hbm [shape: bf16[128,128], index: 3, kind: input, shape index: {}]   ;;  %s591_s4 = inlined_call_operand.vmem [shape: f32[1,128], index: 4, kind: input, shape index: {}]   ;;  %s592_s5 = inlined_call_operand.hbm [shape: f32[16,128], index: 5, kind: output, shape index: {}]  }
   0x1   :  { %11 = vsyncpa [#allocation7], 0  ;;  %s30_s20 = sshll.u32 %s588_s1, 4  ;;  %s31_s20 = int_to_ptr.hbm [resolvable:$true] %s30_s20 }
   0x2   :  { %12 = vsyncpa [#allocation5], 0  ;;  %s525_s21 = smov [#allocation6]   ;;  %s17_s25 = sshll.u32 %s587_s0, 4  ;;  %s18_s25 = int_to_ptr.hbm [resolvable:$true] %s17_s25 }
   0x3   :  { %s32_s22 = sshll.u32 %s525_s21, 4  ;;  %s526_s26 = smov 64   ;;  %s33_s22 = int_to_ptr.vmem [resolvable:$true] %s32_s22 }
   0x4   :  { %s527_s27 = smov 4   ;;  %s528_s28 = smov [#allocation3]  }
   0x5   :  { %38 = dma.hbm_to_vmem [thread:$0]  %s31_s20, 1024, %s33_s22, [#allocation7], %s526_s26, %s526_s26, %s527_s27  }
   0x6   :  { %s19_s29 = sshll.u32 %s528_s28, 4  ;;  %s529_s30 = smov 128   ;;  %s20_s29 = int_to_ptr.vmem [resolvable:$true] %s19_s29 }
   0x7   :  { %s530_s6 = smov 8   ;;  %s45_s8 = sshll.u32 %s590_s3, 4  ;;  %s46_s8 = int_to_ptr.hbm [resolvable:$true] %s45_s8 }
   0x8   :  { %25 = dma.hbm_to_vmem [thread:$0]  %s18_s25, 256, %s20_s29, [#allocation4], %s529_s30, %s529_s30, %s530_s6  }
   0x9   :  { %s531_s9 = smov [#allocation8]  }
   0xa   :  { %s47_s0 = sshll.u32 %s531_s9, 4  ;;  %s48_s0 = int_to_ptr.vmem [resolvable:$true] %s47_s0 }
   0xb   :  { %53 = dma.hbm_to_vmem [thread:$0]  %s46_s8, 1024, %s48_s0, [#allocation7], %s526_s26, %s526_s26, %s527_s27  }
   0xc   :  { %519 = dma.done.wait [#allocation4], 256  }
   0xd   :  { %520 = vsyncadd [#allocation4], 4294967040 }
   0xe   :  { %521 = dma.done.wait [#allocation7], 2048  }
   0xf   :  { %522 = vsyncadd [#allocation7], 4294965248  ;;  %v390_v0 = vld [vmem:[#allocation6 + $0x38] sm:$0xff]  ;;  %v389_v1 = vld [vmem:[#allocation6 + $0x30] sm:$0xff]  ;;  %s532_s12 = smov [#allocation9]   ;;  %s299_s16 = sshll.u32 %s592_s5, 4  ;;  %s300_s16 = int_to_ptr.hbm [resolvable:$true] %s299_s16 }
  0x10   :  { %143 = vmatpush.bf16.msra.mxu0 %v390_v0  ;;  %v388_v2 = vld [vmem:[#allocation6 + $0x28] sm:$0xff]  ;;  %v387_v3 = vld [vmem:[#allocation6 + $0x20] sm:$0xff]  ;;  %v386_v4 = vld [vmem:[#allocation6 + $0x18] sm:$0xff]  ;;  %s297_s13 = sshll.u32 %s532_s12, 4  ;;  %s298_s13 = int_to_ptr.vmem [resolvable:$true] %s297_s13 }
  0x11   :  { %v385_v5 = vld [vmem:[#allocation6 + $0x10] sm:$0xff]  ;;  %v384_v6 = vld [vmem:[#allocation6 + $0x8] sm:$0xff]  ;;  %v383_v7 = vld [vmem:[#allocation6] sm:$0xff] }
  0x12   :  { %v72_v8 = vld [vmem:[#allocation3] sm:$0xff]  ;;  %v73_v9 = vld [vmem:[#allocation3 + $0x8] sm:$0xff]  ;;  %v397_v13 = vld [vmem:[#allocation8 + $0x28] sm:$0xff] }
  0x13   :  { %v74_v10 = vpack.c.bf16 %v73_v9, %v72_v8  ;;  %v399_v11 = vld [vmem:[#allocation8 + $0x38] sm:$0xff]  ;;  %v398_v12 = vld [vmem:[#allocation8 + $0x30] sm:$0xff]  ;;  %v413_v14 = vld [vmem:[%s589_s2] ss:$0 sm:$0xff] }
  0x14   :  { %144 = vmatpush.bf16.msra.mxu0 %v389_v1  ;;  %277 = vmatpush.bf16.msra.mxu1 %v399_v11  ;;  %v396_v15 = vld [vmem:[#allocation8 + $0x20] sm:$0xff]  ;;  %v395_v19 = vld [vmem:[#allocation8 + $0x18] sm:$0xff]  ;;  %v394_v20 = vld [vmem:[#allocation8 + $0x10] sm:$0xff] }
  0x15   :  { %v393_v25 = vld [vmem:[#allocation8 + $0x8] sm:$0xff]  ;;  %v392_v27 = vld [vmem:[#allocation8] sm:$0xff] }
  0x16   :  { %v414_v54 = vld [vmem:[%s591_s4] ss:$0 sm:$0xff] }
  0x18   :  { %145 = vmatpush.bf16.msra.mxu0 %v388_v2  ;;  %278 = vmatpush.bf16.msra.mxu1 %v398_v12 }
  0x1c   :  { %146 = vmatpush.bf16.msra.mxu0 %v387_v3  ;;  %279 = vmatpush.bf16.msra.mxu1 %v397_v13 }
  0x20   :  { %147 = vmatpush.bf16.msra.mxu0 %v386_v4  ;;  %280 = vmatpush.bf16.msra.mxu1 %v396_v15 }
  0x24   :  { %148 = vmatpush.bf16.msra.mxu0 %v385_v5  ;;  %281 = vmatpush.bf16.msra.mxu1 %v395_v19 }
  0x28   :  { %149 = vmatpush.bf16.msra.mxu0 %v384_v6  ;;  %282 = vmatpush.bf16.msra.mxu1 %v394_v20 }
  0x2c   :  { %150 = vmatpush.bf16.msra.mxu0 %v383_v7  ;;  %283 = vmatpush.bf16.msra.mxu1 %v393_v25 }
  0x2f   :  { %151 = vmatmul.bf16.vlgmr.msra.gmra.mxu0 %v74_v10 }
  0x30   :  { %284 = vmatpush.bf16.msra.mxu1 %v392_v27 }
  0xac   :  { %v152_v16 = vpop.f32.mrf.mxu0 }
  0xad   :  { %v153_v17 = vadd.f32 %v413_v14, %v152_v16 }
  0xaf   :  { %v345_v18 = vmul.f32 -1.442695, %v153_v17 }
  0xb1   :  { %415 = vpow2.f32 %v345_v18 }
  0xb4   :  { %v154_v21 = vpop.f32.mrf.mxu0 }
  0xb5   :  { %v155_v22 = vadd.f32 %v413_v14, %v154_v21 }
  0xb7   :  { %v416_v23 = vpop.eup %415  ;;  %v346_v24 = vmul.f32 -1.442695, %v155_v22 }
  0xb8   :  { %v163_v26 = vadd.f32 1.0, %v416_v23 }
  0xb9   :  { %417 = vpow2.f32 %v346_v24 }
  0xba   :  { %419 = vrcp.f32 %v163_v26  ;;  %v176_v37 = vand.u32 2147483648, %v163_v26  ;;  %vm170_vm1 = vweird.f32 %v163_v26  ;;  %v174_v38 = vand.u32 2147483647, %v163_v26 }
  0xbc   :  { %v177_v44 = vor.u32 1.1754944e-38, %v176_v37  ;;  %vm175_vm4 = vcmp.eq.f32.partialorder %v174_v38, 8.507059e+37 }
  0xbf   :  { %v418_v28 = vpop.eup %417 }
  0xc0   :  { %v420_v29 = vpop.eup %419  ;;  %v164_v30 = vadd.f32 1.0, %v418_v28 }
  0xc1   :  { %v166_v31 = vmul.f32 %v420_v29, %v163_v26  ;;  %vm171_vm0 = vweird.f32 %v420_v29 }
  0xc2   :  { %421 = vrcp.f32 %v164_v30  ;;  %vm172_vm2 = vmor %vm170_vm1, %vm171_vm0  ;;  %v191_v40 = vand.u32 2147483648, %v164_v30  ;;  %v189_v43 = vand.u32 2147483647, %v164_v30  ;;  %vm185_vm5 = vweird.f32 %v164_v30 }
  0xc3   :  { %v167_v32 = vsub.f32 1.0, %v166_v31 }
  0xc4   :  { %v192_v47 = vor.u32 1.1754944e-38, %v191_v40  ;;  %vm190_vm7 = vcmp.eq.f32.partialorder %v189_v43, 8.507059e+37 }
  0xc5   :  { %v168_v33 = vmul.f32 %v420_v29, %v167_v32 }
  0xc7   :  { %v169_v35 = vadd.f32 %v420_v29, %v168_v33 }
  0xc8   :  { %v422_v34 = vpop.eup %421 }
  0xc9   :  { %v181_v36 = vmul.f32 %v422_v34, %v164_v30  ;;  %v173_v41 = vsel %vm172_vm2, %v420_v29, %v169_v35  ;;  %vm186_vm3 = vweird.f32 %v422_v34 }
  0xca   :  { %v178_v46 = vsel %vm175_vm4, %v177_v44, %v173_v41  ;;  %vm187_vm6 = vmor %vm185_vm5, %vm186_vm3 }
  0xcb   :  { %v182_v39 = vsub.f32 1.0, %v181_v36  ;;  %v195_v50 = vmul.f32 %v178_v46, %v153_v17 }
  0xcd   :  { %v183_v42 = vmul.f32 %v422_v34, %v182_v39 }
  0xcf   :  { %v184_v45 = vadd.f32 %v422_v34, %v183_v42 }
  0xd1   :  { %v188_v48 = vsel %vm187_vm6, %v422_v34, %v184_v45 }
  0xd2   :  { %v193_v49 = vsel %vm190_vm7, %v192_v47, %v188_v48 }
  0xd3   :  { %v196_v51 = vmul.f32 %v193_v49, %v155_v22 }
  0xd5   :  { %v403_v52 = vpack.c.bf16 %v196_v51, %v195_v50 }
  0xd7   :  { %404 = vst [vmem:[#allocation2] sm:$0xff] %v403_v52  }
  0xde   :  { %v391_v53 = vld [vmem:[#allocation2] sm:$0xff] }
  0xdf   :  { %285 = vmatmul.bf16.vlgmr.msra.gmra.mxu1 %v391_v53 }
 0x15c   :  { %v286_v55 = vpop.f32.mrf.mxu1 }
 0x15d   :  { %v287_v56 = vadd.f32 %v414_v54, %v286_v55 }
 0x15f   :  { %291 = vst [vmem:[#allocation9] sm:$0xff] %v287_v56 }
 0x164   :  { %v288_v57 = vpop.f32.mrf.mxu1 }
 0x165   :  { %v289_v58 = vadd.f32 %v414_v54, %v288_v57 }
 0x167   :  { %292 = vst [vmem:[#allocation9 + $0x8] sm:$0xff] %v289_v58 }
 0x168   :  { %305 = dma.vmem_to_hbm [thread:$0]  %s298_s13, 256, %s300_s16, [#allocation5], %s529_s30, %s529_s30, %s530_s6  }
 0x169   :  { %523 = dma.done.wait [#allocation5], 256  }
 0x16a   :  { %524 = vsyncadd [#allocation5], 4294967040 }
 0x16b   :  { %310 = vsyncpa [#allocation4], 1 }
 0x16c   :  { %311 = vsyncpa [#allocation7], 1 }
 0x16d   :  { %312 = vsyncpa [#allocation5], 1 }

// kernel: tpu_custom_call.1
= control target key start
LH: loop header
LB: loop body
LE: loop exit
PB: predicated region body
PF: predicated region fallthrough
CT: control target
= control target key end

     0   :  { %10 = vsyncpa [#allocation4], 0  ;;  %s587_s0 = inlined_call_operand.hbm [shape: f32[16,128], index: 0, kind: input, shape index: {}]   ;;  %s588_s1 = inlined_call_operand.hbm [shape: bf16[128,128], index: 1, kind: input, shape index: {}]   ;;  %s589_s2 = inlined_call_operand.vmem [shape: f32[1,128], index: 2, kind: input, shape index: {}]   ;;  %s590_s3 = inlined_call_operand.hbm [shape: bf16[128,128], index: 3, kind: input, shape index: {}]   ;;  %s591_s4 = inlined_call_operand.vmem [shape: f32[1,128], index: 4, kind: input, shape index: {}]   ;;  %s592_s5 = inlined_call_operand.hbm [shape: f32[16,128], index: 5, kind: output, shape index: {}]  }
   0x1   :  { %11 = vsyncpa [#allocation7], 0  ;;  %s30_s20 = sshll.u32 %s588_s1, 4  ;;  %s31_s20 = int_to_ptr.hbm [resolvable:$true] %s30_s20 }
   0x2   :  { %12 = vsyncpa [#allocation5], 0  ;;  %s525_s21 = smov [#allocation6]   ;;  %s17_s25 = sshll.u32 %s587_s0, 4  ;;  %s18_s25 = int_to_ptr.hbm [resolvable:$true] %s17_s25 }
   0x3   :  { %s32_s22 = sshll.u32 %s525_s21, 4  ;;  %s526_s26 = smov 64   ;;  %s33_s22 = int_to_ptr.vmem [resolvable:$true] %s32_s22 }
   0x4   :  { %s527_s27 = smov 4   ;;  %s528_s28 = smov [#allocation3]  }
   0x5   :  { %38 = dma.hbm_to_vmem [thread:$0]  %s31_s20, 1024, %s33_s22, [#allocation7], %s526_s26, %s526_s26, %s527_s27  }
   0x6   :  { %s19_s29 = sshll.u32 %s528_s28, 4  ;;  %s529_s30 = smov 128   ;;  %s20_s29 = int_to_ptr.vmem [resolvable:$true] %s19_s29 }
   0x7   :  { %s530_s6 = smov 8   ;;  %s45_s8 = sshll.u32 %s590_s3, 4  ;;  %s46_s8 = int_to_ptr.hbm [resolvable:$true] %s45_s8 }
   0x8   :  { %25 = dma.hbm_to_vmem [thread:$0]  %s18_s25, 256, %s20_s29, [#allocation4], %s529_s30, %s529_s30, %s530_s6  }
   0x9   :  { %s531_s9 = smov [#allocation8]  }
   0xa   :  { %s47_s0 = sshll.u32 %s531_s9, 4  ;;  %s48_s0 = int_to_ptr.vmem [resolvable:$true] %s47_s0 }
   0xb   :  { %53 = dma.hbm_to_vmem [thread:$0]  %s46_s8, 1024, %s48_s0, [#allocation7], %s526_s26, %s526_s26, %s527_s27  }
   0xc   :  { %519 = dma.done.wait [#allocation4], 256  }
   0xd   :  { %520 = vsyncadd [#allocation4], 4294967040 }
   0xe   :  { %521 = dma.done.wait [#allocation7], 2048  }
   0xf   :  { %522 = vsyncadd [#allocation7], 4294965248  ;;  %v390_v0 = vld [vmem:[#allocation6 + $0x38] sm:$0xff]  ;;  %v389_v1 = vld [vmem:[#allocation6 + $0x30] sm:$0xff]  ;;  %s532_s12 = smov [#allocation9]   ;;  %s299_s16 = sshll.u32 %s592_s5, 4  ;;  %s300_s16 = int_to_ptr.hbm [resolvable:$true] %s299_s16 }
  0x10   :  { %143 = vmatpush.bf16.msra.mxu0 %v390_v0  ;;  %v388_v2 = vld [vmem:[#allocation6 + $0x28] sm:$0xff]  ;;  %v387_v3 = vld [vmem:[#allocation6 + $0x20] sm:$0xff]  ;;  %v386_v4 = vld [vmem:[#allocation6 + $0x18] sm:$0xff]  ;;  %s297_s13 = sshll.u32 %s532_s12, 4  ;;  %s298_s13 = int_to_ptr.vmem [resolvable:$true] %s297_s13 }
  0x11   :  { %v385_v5 = vld [vmem:[#allocation6 + $0x10] sm:$0xff]  ;;  %v384_v6 = vld [vmem:[#allocation6 + $0x8] sm:$0xff]  ;;  %v383_v7 = vld [vmem:[#allocation6] sm:$0xff] }
  0x12   :  { %v72_v8 = vld [vmem:[#allocation3] sm:$0xff]  ;;  %v73_v9 = vld [vmem:[#allocation3 + $0x8] sm:$0xff]  ;;  %v397_v13 = vld [vmem:[#allocation8 + $0x28] sm:$0xff] }
  0x13   :  { %v74_v10 = vpack.c.bf16 %v73_v9, %v72_v8  ;;  %v399_v11 = vld [vmem:[#allocation8 + $0x38] sm:$0xff]  ;;  %v398_v12 = vld [vmem:[#allocation8 + $0x30] sm:$0xff]  ;;  %v413_v14 = vld [vmem:[%s589_s2] ss:$0 sm:$0xff] }
  0x14   :  { %144 = vmatpush.bf16.msra.mxu0 %v389_v1  ;;  %277 = vmatpush.bf16.msra.mxu1 %v399_v11  ;;  %v396_v15 = vld [vmem:[#allocation8 + $0x20] sm:$0xff]  ;;  %v395_v19 = vld [vmem:[#allocation8 + $0x18] sm:$0xff]  ;;  %v394_v20 = vld [vmem:[#allocation8 + $0x10] sm:$0xff] }
  0x15   :  { %v393_v25 = vld [vmem:[#allocation8 + $0x8] sm:$0xff]  ;;  %v392_v27 = vld [vmem:[#allocation8] sm:$0xff] }
  0x16   :  { %v414_v54 = vld [vmem:[%s591_s4] ss:$0 sm:$0xff] }
  0x18   :  { %145 = vmatpush.bf16.msra.mxu0 %v388_v2  ;;  %278 = vmatpush.bf16.msra.mxu1 %v398_v12 }
  0x1c   :  { %146 = vmatpush.bf16.msra.mxu0 %v387_v3  ;;  %279 = vmatpush.bf16.msra.mxu1 %v397_v13 }
  0x20   :  { %147 = vmatpush.bf16.msra.mxu0 %v386_v4  ;;  %280 = vmatpush.bf16.msra.mxu1 %v396_v15 }
  0x24   :  { %148 = vmatpush.bf16.msra.mxu0 %v385_v5  ;;  %281 = vmatpush.bf16.msra.mxu1 %v395_v19 }
  0x28   :  { %149 = vmatpush.bf16.msra.mxu0 %v384_v6  ;;  %282 = vmatpush.bf16.msra.mxu1 %v394_v20 }
  0x2c   :  { %150 = vmatpush.bf16.msra.mxu0 %v383_v7  ;;  %283 = vmatpush.bf16.msra.mxu1 %v393_v25 }
  0x2f   :  { %151 = vmatmul.bf16.vlgmr.msra.gmra.mxu0 %v74_v10 }
  0x30   :  { %284 = vmatpush.bf16.msra.mxu1 %v392_v27 }
  0xac   :  { %v152_v16 = vpop.f32.mrf.mxu0 }
  0xad   :  { %v153_v17 = vadd.f32 %v413_v14, %v152_v16 }
  0xaf   :  { %v345_v18 = vmul.f32 -1.442695, %v153_v17 }
  0xb1   :  { %415 = vpow2.f32 %v345_v18 }
  0xb4   :  { %v154_v21 = vpop.f32.mrf.mxu0 }
  0xb5   :  { %v155_v22 = vadd.f32 %v413_v14, %v154_v21 }
  0xb7   :  { %v416_v23 = vpop.eup %415  ;;  %v346_v24 = vmul.f32 -1.442695, %v155_v22 }
  0xb8   :  { %v163_v26 = vadd.f32 1.0, %v416_v23 }
  0xb9   :  { %417 = vpow2.f32 %v346_v24 }
  0xba   :  { %419 = vrcp.f32 %v163_v26  ;;  %v176_v37 = vand.u32 2147483648, %v163_v26  ;;  %vm170_vm1 = vweird.f32 %v163_v26  ;;  %v174_v38 = vand.u32 2147483647, %v163_v26 }
  0xbc   :  { %v177_v44 = vor.u32 1.1754944e-38, %v176_v37  ;;  %vm175_vm4 = vcmp.eq.f32.partialorder %v174_v38, 8.507059e+37 }
  0xbf   :  { %v418_v28 = vpop.eup %417 }
  0xc0   :  { %v420_v29 = vpop.eup %419  ;;  %v164_v30 = vadd.f32 1.0, %v418_v28 }
  0xc1   :  { %v166_v31 = vmul.f32 %v420_v29, %v163_v26  ;;  %vm171_vm0 = vweird.f32 %v420_v29 }
  0xc2   :  { %421 = vrcp.f32 %v164_v30  ;;  %vm172_vm2 = vmor %vm170_vm1, %vm171_vm0  ;;  %v191_v40 = vand.u32 2147483648, %v164_v30  ;;  %v189_v43 = vand.u32 2147483647, %v164_v30  ;;  %vm185_vm5 = vweird.f32 %v164_v30 }
  0xc3   :  { %v167_v32 = vsub.f32 1.0, %v166_v31 }
  0xc4   :  { %v192_v47 = vor.u32 1.1754944e-38, %v191_v40  ;;  %vm190_vm7 = vcmp.eq.f32.partialorder %v189_v43, 8.507059e+37 }
  0xc5   :  { %v168_v33 = vmul.f32 %v420_v29, %v167_v32 }
  0xc7   :  { %v169_v35 = vadd.f32 %v420_v29, %v168_v33 }
  0xc8   :  { %v422_v34 = vpop.eup %421 }
  0xc9   :  { %v181_v36 = vmul.f32 %v422_v34, %v164_v30  ;;  %v173_v41 = vsel %vm172_vm2, %v420_v29, %v169_v35  ;;  %vm186_vm3 = vweird.f32 %v422_v34 }
  0xca   :  { %v178_v46 = vsel %vm175_vm4, %v177_v44, %v173_v41  ;;  %vm187_vm6 = vmor %vm185_vm5, %vm186_vm3 }
  0xcb   :  { %v182_v39 = vsub.f32 1.0, %v181_v36  ;;  %v195_v50 = vmul.f32 %v178_v46, %v153_v17 }
  0xcd   :  { %v183_v42 = vmul.f32 %v422_v34, %v182_v39 }
  0xcf   :  { %v184_v45 = vadd.f32 %v422_v34, %v183_v42 }
  0xd1   :  { %v188_v48 = vsel %vm187_vm6, %v422_v34, %v184_v45 }
  0xd2   :  { %v193_v49 = vsel %vm190_vm7, %v192_v47, %v188_v48 }
  0xd3   :  { %v196_v51 = vmul.f32 %v193_v49, %v155_v22 }
  0xd5   :  { %v403_v52 = vpack.c.bf16 %v196_v51, %v195_v50 }
  0xd7   :  { %404 = vst [vmem:[#allocation2] sm:$0xff] %v403_v52  }
  0xde   :  { %v391_v53 = vld [vmem:[#allocation2] sm:$0xff] }
  0xdf   :  { %285 = vmatmul.bf16.vlgmr.msra.gmra.mxu1 %v391_v53 }
 0x15c   :  { %v286_v55 = vpop.f32.mrf.mxu1 }
 0x15d   :  { %v287_v56 = vadd.f32 %v414_v54, %v286_v55 }
 0x15f   :  { %291 = vst [vmem:[#allocation9] sm:$0xff] %v287_v56 }
 0x164   :  { %v288_v57 = vpop.f32.mrf.mxu1 }
 0x165   :  { %v289_v58 = vadd.f32 %v414_v54, %v288_v57 }
 0x167   :  { %292 = vst [vmem:[#allocation9 + $0x8] sm:$0xff] %v289_v58 }
 0x168   :  { %305 = dma.vmem_to_hbm [thread:$0]  %s298_s13, 256, %s300_s16, [#allocation5], %s529_s30, %s529_s30, %s530_s6  }
 0x169   :  { %523 = dma.done.wait [#allocation5], 256  }
 0x16a   :  { %524 = vsyncadd [#allocation5], 4294967040 }
 0x16b   :  { %310 = vsyncpa [#allocation4], 1 }
 0x16c   :  { %311 = vsyncpa [#allocation7], 1 }
 0x16d   :  { %312 = vsyncpa [#allocation5], 1 }

</bundles_post_ra>
